<compile_context>
chip_gen: v7x
topology: tpu7x:2x2x1
jax: 0.10.0
libtpu: 0.0.40
codegen_flags: <defaults>
</compile_context>

<pallas_src>
import jax
import jax.numpy as jnp
from jax.experimental import pallas as pl
from jax.experimental.pallas import tpu as pltpu

_TB_MAX = 2048  # max batch tile (rows); ~7 MB peak VMEM at this size


def _round_up(n, m):
    return (n + m - 1) // m * m


def stressnet_kernel(x_ref, w1_ref, b1_ref, w2_ref, b2_ref, wd_ref, bd_ref, o_ref):
    # x tile: (TB, 29) f32 -> cast to bf16 in-kernel (MXU operands bf16, f32 acc).
    x = x_ref[...].astype(jnp.bfloat16)

    # fc1: (TB, 29) @ (29, 128) + b1, ReLU    (bias/ReLU in f32)
    h1 = jnp.dot(x, w1_ref[...], preferred_element_type=jnp.float32) + b1_ref[...]
    h1 = jnp.maximum(h1, 0.0)

    # fc2: (TB, 128) @ (128, 256) + b2, ReLU
    h2 = jnp.dot(h1.astype(jnp.bfloat16), w2_ref[...],
                 preferred_element_type=jnp.float32) + b2_ref[...]
    h2 = jnp.maximum(h2, 0.0)

    # fc3 collapsed to a single logit difference: column 0 of wd holds
    # w3[:,1]-w3[:,0]; remaining 127 lanes are zero padding.
    d_full = jnp.dot(h2.astype(jnp.bfloat16), wd_ref[...],
                     preferred_element_type=jnp.float32) + bd_ref[...]   # (TB, 128)
    d = d_full[:, 0:1]                                                   # (TB, 1)

    # 2-class log-softmax: logp0 = -softplus(d), logp1 = -softplus(-d),
    # with the numerically stable softplus(z) = max(z,0) + log(1 + exp(-|z|)).
    def softplus(z):
        return jnp.maximum(z, 0.0) + jnp.log(1.0 + jnp.exp(-jnp.abs(z)))

    logp0 = -softplus(d)
    logp1 = -softplus(-d)

    # Store only the 2 real classes (tiny masked store; minimal HBM writeback).
    o_ref[...] = jnp.concatenate([logp0, logp1], axis=-1).astype(o_ref.dtype)


def prepare_params(params):
    """One-time layout prep (hoisted out of the forward): bf16 weights, fc3
    reduced to the class-1 minus class-0 difference column, padded to 128 lanes."""
    w1, b1, w2, b2, w3, b3 = params
    bf = jnp.bfloat16
    w1_p = w1.astype(bf)                                    # (29, 128)
    w2_p = w2.astype(bf)                                    # (128, 256)
    wd = (w3[:, 1] - w3[:, 0]).astype(bf)                   # (256,)
    wd_p = jnp.zeros((256, 128), bf).at[:, 0].set(wd)       # (256, 128), col 0 real
    bd_p = jnp.full((1, 128), b3[0, 1] - b3[0, 0], jnp.float32)
    return (w1_p, b1, w2_p, b2, wd_p, bd_p)


def _choose_tiling(B):
    """Pick (TB, n_tiles): TB multiple of 16 (bf16 sublane packing), capped at
    _TB_MAX, and >= 2 grid steps whenever B > 16 so both v7x TCs get work."""
    B16 = _round_up(max(B, 1), 16)
    n_tiles = 1 if B16 <= 16 else max(2, -(-B16 // _TB_MAX))
    TB = _round_up(-(-B16 // n_tiles), 16)
    return TB, n_tiles


@jax.jit
def stressnet_forward(x, prepared):
    """x: (B, 29) float32. prepared: output of prepare_params(params)."""
    w1_p, b1, w2_p, b2, wd_p, bd_p = prepared
    B = x.shape[0]

    TB, n_tiles = _choose_tiling(B)
    B_pad = n_tiles * TB
    x_in = x if B_pad == B else jnp.pad(x, ((0, B_pad - B), (0, 0)))

    # Weights/biases: constant index_map -> fetched once, resident in VMEM.
    resident = lambda shape: pl.BlockSpec(shape, lambda i: (0, 0))

    out = pl.pallas_call(
        stressnet_kernel,
        out_shape=jax.ShapeDtypeStruct((B_pad, 2), jnp.float32),
        grid=(n_tiles,),
        in_specs=[
            pl.BlockSpec((TB, 29), lambda i: (i, 0)),    # x tiles stream (f32)
            resident((29, 128)), resident((1, 128)),     # fc1
            resident((128, 256)), resident((1, 256)),    # fc2
            resident((256, 128)), resident((1, 128)),    # fc3 difference column
        ],
        out_specs=pl.BlockSpec((TB, 2), lambda i: (i, 0)),
        compiler_params=pltpu.CompilerParams(
            dimension_semantics=("parallel",),
            vmem_limit_bytes=32 * 1024 * 1024),
    )(x_in, w1_p, b1, w2_p, b2, wd_p, bd_p)
    return out[:B]


def init_params(key):
    """Mimic PyTorch default Linear init: U(-1/sqrt(fan_in), 1/sqrt(fan_in))."""
    def linear(k, fan_in, fan_out):
        kw, kb = jax.random.split(k)
        bound = 1.0 / jnp.sqrt(fan_in)
        w = jax.random.uniform(kw, (fan_in, fan_out), jnp.float32, -bound, bound)
        b = jax.random.uniform(kb, (1, fan_out), jnp.float32, -bound, bound)
        return w, b

    k1, k2, k3 = jax.random.split(key, 3)
    w1, b1 = linear(k1, 29, 128)
    w2, b2 = linear(k2, 128, 256)
    w3, b3 = linear(k3, 256, 2)
    return (w1, b1, w2, b2, w3, b3)


if __name__ == "__main__":
    key = jax.random.PRNGKey(0)
    k_param, k_x = jax.random.split(key)

    params = init_params(k_param)
    prepared = prepare_params(params)

    B = 20                      # not a multiple of 16: exercises batch padding + 2-tile grid
    x = jax.random.normal(k_x, (B, 29), jnp.float32)

    out = jax.block_until_ready(stressnet_forward(x, prepared))
    assert out.shape == (B, 2)

    # Reference with matching matmul numerics (bf16 MXU operands, f32 accumulation),
    # but the standard full log-softmax formulation.
    w1, b1, w2, b2, w3, b3 = params
    bf = jnp.bfloat16
    h1 = jnp.maximum(jnp.dot(x.astype(bf), w1.astype(bf),
                             preferred_element_type=jnp.float32) + b1, 0.0)
    h2 = jnp.maximum(jnp.dot(h1.astype(bf), w2.astype(bf),
                             preferred_element_type=jnp.float32) + b2, 0.0)
    logits = jnp.dot(h2.astype(bf), w3.astype(bf),
                     preferred_element_type=jnp.float32) + b3
    ref = jax.nn.log_softmax(logits, axis=1)
    assert jnp.allclose(out, ref, atol=1e-2, rtol=1e-2), \
        float(jnp.max(jnp.abs(out - ref)))

    print("KERNEL_OK")
</pallas_src>

<mosaic_0001>
module attributes {stable_mosaic.version = 11 : i64} {
  func.func @stressnet_kernel(%arg0: i32, %arg1: memref<16x29xf32, #tpu.memory_space<vmem>>, %arg2: memref<29x128xbf16, #tpu.memory_space<vmem>>, %arg3: memref<1x128xf32, #tpu.memory_space<vmem>>, %arg4: memref<128x256xbf16, #tpu.memory_space<vmem>>, %arg5: memref<1x256xf32, #tpu.memory_space<vmem>>, %arg6: memref<256x128xbf16, #tpu.memory_space<vmem>>, %arg7: memref<1x128xf32, #tpu.memory_space<vmem>>, %arg8: memref<16x2xf32, #tpu.memory_space<vmem>>) attributes {dimension_semantics = [#tpu.dimension_semantics<parallel>], iteration_bounds = array<i64: 2>, scalar_prefetch = 0 : i64, scratch_operands = 0 : i64, tpu.core_type = #tpu.core_type<tc>, window_params = [{transform_indices = @transform_0, window_bounds = array<i64: 16, 29>}, {pipeline_mode = #tpu.pipeline_mode<synchronous>, transform_indices = @transform_1, window_bounds = array<i64: 29, 128>}, {pipeline_mode = #tpu.pipeline_mode<synchronous>, transform_indices = @transform_2, window_bounds = array<i64: 1, 128>}, {pipeline_mode = #tpu.pipeline_mode<synchronous>, transform_indices = @transform_3, window_bounds = array<i64: 128, 256>}, {pipeline_mode = #tpu.pipeline_mode<synchronous>, transform_indices = @transform_4, window_bounds = array<i64: 1, 256>}, {pipeline_mode = #tpu.pipeline_mode<synchronous>, transform_indices = @transform_5, window_bounds = array<i64: 256, 128>}, {pipeline_mode = #tpu.pipeline_mode<synchronous>, transform_indices = @transform_6, window_bounds = array<i64: 1, 128>}, {transform_indices = @transform_7, window_bounds = array<i64: 16, 2>}]} {
    %c0 = arith.constant 0 : index
    %c0_0 = arith.constant 0 : index
    %0 = vector.load %arg1[%c0, %c0_0] : memref<16x29xf32, #tpu.memory_space<vmem>>, vector<16x29xf32>
    %1 = arith.truncf %0 : vector<16x29xf32> to vector<16x29xbf16>
    %c0_1 = arith.constant 0 : index
    %c0_2 = arith.constant 0 : index
    %2 = vector.load %arg2[%c0_1, %c0_2] : memref<29x128xbf16, #tpu.memory_space<vmem>>, vector<29x128xbf16>
    %cst = arith.constant dense<0.000000e+00> : vector<16x128xf32>
    %3 = tpu.matmul %1, %2, %cst {dimension_numbers = #tpu.dot_dimension_numbers<[1], [0], [0], [1], [0, 0, 1, 1], [], []>} : vector<16x29xbf16>, vector<29x128xbf16>, vector<16x128xf32> -> vector<16x128xf32>
    %c0_3 = arith.constant 0 : index
    %c0_4 = arith.constant 0 : index
    %4 = vector.load %arg3[%c0_3, %c0_4] : memref<1x128xf32, #tpu.memory_space<vmem>>, vector<1x128xf32>
    %5 = vector.broadcast %4 : vector<1x128xf32> to vector<16x128xf32>
    %6 = arith.addf %3, %5 : vector<16x128xf32>
    %cst_5 = arith.constant 0.000000e+00 : f32
    %7 = vector.broadcast %cst_5 : f32 to vector<16x128xf32>
    %8 = arith.maximumf %6, %7 : vector<16x128xf32>
    %9 = arith.truncf %8 : vector<16x128xf32> to vector<16x128xbf16>
    %c0_6 = arith.constant 0 : index
    %c0_7 = arith.constant 0 : index
    %10 = vector.load %arg4[%c0_6, %c0_7] : memref<128x256xbf16, #tpu.memory_space<vmem>>, vector<128x256xbf16>
    %cst_8 = arith.constant dense<0.000000e+00> : vector<16x256xf32>
    %11 = tpu.matmul %9, %10, %cst_8 {dimension_numbers = #tpu.dot_dimension_numbers<[1], [0], [0], [1], [0, 0, 1, 1], [], []>} : vector<16x128xbf16>, vector<128x256xbf16>, vector<16x256xf32> -> vector<16x256xf32>
    %c0_9 = arith.constant 0 : index
    %c0_10 = arith.constant 0 : index
    %12 = vector.load %arg5[%c0_9, %c0_10] : memref<1x256xf32, #tpu.memory_space<vmem>>, vector<1x256xf32>
    %13 = vector.broadcast %12 : vector<1x256xf32> to vector<16x256xf32>
    %14 = arith.addf %11, %13 : vector<16x256xf32>
    %cst_11 = arith.constant 0.000000e+00 : f32
    %15 = vector.broadcast %cst_11 : f32 to vector<16x256xf32>
    %16 = arith.maximumf %14, %15 : vector<16x256xf32>
    %17 = arith.truncf %16 : vector<16x256xf32> to vector<16x256xbf16>
    %c0_12 = arith.constant 0 : index
    %c0_13 = arith.constant 0 : index
    %18 = vector.load %arg6[%c0_12, %c0_13] : memref<256x128xbf16, #tpu.memory_space<vmem>>, vector<256x128xbf16>
    %cst_14 = arith.constant dense<0.000000e+00> : vector<16x128xf32>
    %19 = tpu.matmul %17, %18, %cst_14 {dimension_numbers = #tpu.dot_dimension_numbers<[1], [0], [0], [1], [0, 0, 1, 1], [], []>} : vector<16x256xbf16>, vector<256x128xbf16>, vector<16x128xf32> -> vector<16x128xf32>
    %c0_15 = arith.constant 0 : index
    %c0_16 = arith.constant 0 : index
    %20 = vector.load %arg7[%c0_15, %c0_16] : memref<1x128xf32, #tpu.memory_space<vmem>>, vector<1x128xf32>
    %21 = vector.broadcast %20 : vector<1x128xf32> to vector<16x128xf32>
    %22 = arith.addf %19, %21 : vector<16x128xf32>
    %23 = vector.extract_strided_slice %22 {offsets = [0, 0], sizes = [16, 1], strides = [1, 1]} : vector<16x128xf32> to vector<16x1xf32>
    %cst_17 = arith.constant 0.000000e+00 : f32
    %24 = vector.broadcast %cst_17 : f32 to vector<16x1xf32>
    %25 = arith.maximumf %23, %24 : vector<16x1xf32>
    %26 = math.absf %23 : vector<16x1xf32>
    %cst_18 = arith.constant 0.000000e+00 : f32
    %27 = vector.broadcast %cst_18 : f32 to vector<16x1xf32>
    %28 = arith.subf %27, %26 : vector<16x1xf32>
    %29 = math.exp %28 : vector<16x1xf32>
    %cst_19 = arith.constant 1.000000e+00 : f32
    %30 = vector.broadcast %cst_19 : f32 to vector<16x1xf32>
    %31 = arith.addf %30, %29 : vector<16x1xf32>
    %32 = math.log %31 : vector<16x1xf32>
    %33 = arith.addf %25, %32 : vector<16x1xf32>
    %cst_20 = arith.constant 0.000000e+00 : f32
    %34 = vector.broadcast %cst_20 : f32 to vector<16x1xf32>
    %35 = arith.subf %34, %33 : vector<16x1xf32>
    %cst_21 = arith.constant 0.000000e+00 : f32
    %36 = vector.broadcast %cst_21 : f32 to vector<16x1xf32>
    %37 = arith.subf %36, %23 : vector<16x1xf32>
    %cst_22 = arith.constant 0.000000e+00 : f32
    %38 = vector.broadcast %cst_22 : f32 to vector<16x1xf32>
    %39 = arith.maximumf %37, %38 : vector<16x1xf32>
    %40 = math.absf %37 : vector<16x1xf32>
    %cst_23 = arith.constant 0.000000e+00 : f32
    %41 = vector.broadcast %cst_23 : f32 to vector<16x1xf32>
    %42 = arith.subf %41, %40 : vector<16x1xf32>
    %43 = math.exp %42 : vector<16x1xf32>
    %cst_24 = arith.constant 1.000000e+00 : f32
    %44 = vector.broadcast %cst_24 : f32 to vector<16x1xf32>
    %45 = arith.addf %44, %43 : vector<16x1xf32>
    %46 = math.log %45 : vector<16x1xf32>
    %47 = arith.addf %39, %46 : vector<16x1xf32>
    %cst_25 = arith.constant 0.000000e+00 : f32
    %48 = vector.broadcast %cst_25 : f32 to vector<16x1xf32>
    %49 = arith.subf %48, %47 : vector<16x1xf32>
    %50 = tpu.concatenate %35, %49 in 1 : vector<16x1xf32>, vector<16x1xf32> -> vector<16x2xf32>
    %c0_26 = arith.constant 0 : index
    %c0_27 = arith.constant 0 : index
    %51 = vector.load %arg8[%c0_26, %c0_27] : memref<16x2xf32, #tpu.memory_space<vmem>>, vector<16x2xf32>
    tpu.vector_store %arg8[%c0_26, %c0_27], %50 {strides = array<i32>} : memref<16x2xf32, #tpu.memory_space<vmem>>, vector<16x2xf32>,
    return
  }
  func.func @transform_0(%arg0: i32) -> (i32, i32) {
    %c0_i32 = arith.constant 0 : i32
    %c0_i32_0 = arith.constant 0 : i32
    return %arg0, %c0_i32 : i32, i32
  }
  func.func @transform_1(%arg0: i32) -> (i32, i32) {
    %c0_i32 = arith.constant 0 : i32
    %c0_i32_0 = arith.constant 0 : i32
    %c0_i32_1 = arith.constant 0 : i32
    return %c0_i32, %c0_i32_0 : i32, i32
  }
  func.func @transform_2(%arg0: i32) -> (i32, i32) {
    %c0_i32 = arith.constant 0 : i32
    %c0_i32_0 = arith.constant 0 : i32
    %c0_i32_1 = arith.constant 0 : i32
    return %c0_i32, %c0_i32_0 : i32, i32
  }
  func.func @transform_3(%arg0: i32) -> (i32, i32) {
    %c0_i32 = arith.constant 0 : i32
    %c0_i32_0 = arith.constant 0 : i32
    %c0_i32_1 = arith.constant 0 : i32
    return %c0_i32, %c0_i32_0 : i32, i32
  }
  func.func @transform_4(%arg0: i32) -> (i32, i32) {
    %c0_i32 = arith.constant 0 : i32
    %c0_i32_0 = arith.constant 0 : i32
    %c0_i32_1 = arith.constant 0 : i32
    return %c0_i32, %c0_i32_0 : i32, i32
  }
  func.func @transform_5(%arg0: i32) -> (i32, i32) {
    %c0_i32 = arith.constant 0 : i32
    %c0_i32_0 = arith.constant 0 : i32
    %c0_i32_1 = arith.constant 0 : i32
    return %c0_i32, %c0_i32_0 : i32, i32
  }
  func.func @transform_6(%arg0: i32) -> (i32, i32) {
    %c0_i32 = arith.constant 0 : i32
    %c0_i32_0 = arith.constant 0 : i32
    %c0_i32_1 = arith.constant 0 : i32
    return %c0_i32, %c0_i32_0 : i32, i32
  }
  func.func @transform_7(%arg0: i32) -> (i32, i32) {
    %c0_i32 = arith.constant 0 : i32
    %c0_i32_0 = arith.constant 0 : i32
    return %arg0, %c0_i32 : i32, i32
  }
}

</mosaic_0001>

<bundles_post_ra>
// kernel: stressnet_forward.1
= control target key start
LH: loop header
LB: loop body
LE: loop exit
PB: predicated region body
PF: predicated region fallthrough
CT: control target
= control target key end

     0   :  { %12 = vsyncpa [#allocation3], 0  ;;  %s1282_s0 = inlined_call_operand.vmem [shape: f32[32,29], index: 0, kind: input, shape index: {}]   ;;  %s1283_s1 = inlined_call_operand.vmem [shape: bf16[29,128], index: 1, kind: input, shape index: {}]   ;;  %s1284_s2 = inlined_call_operand.vmem [shape: f32[1,128], index: 2, kind: input, shape index: {}]   ;;  %s1285_s3 = inlined_call_operand.hbm [shape: bf16[128,256], index: 3, kind: input, shape index: {}]   ;;  %s1286_s4 = inlined_call_operand.vmem [shape: f32[1,256], index: 4, kind: input, shape index: {}]   ;;  %s1287_s5 = inlined_call_operand.hbm [shape: bf16[256,128], index: 5, kind: input, shape index: {}]   ;;  %s1288_s6 = inlined_call_operand.vmem [shape: f32[1,128], index: 6, kind: input, shape index: {}]   ;;  %s1289_s7 = inlined_call_operand.vmem [shape: f32[32,2], index: 7, kind: output, shape index: {}]  }
   0x1   :  { %13 = vsyncpa [#allocation5], 0  ;;  %s1164_s24 = smov 0  }
   0x2 LB: > { %s1113_s25 = smov [#allocation2]   ;;  %s860_s27 = sadd.s32 4294967295, %s1111_s24   ;;  %s1111_s24 = sphi %s1164_s24, %s19_s24  }
   0x3   : > { %s220_s26 = sshll.u32 %s1113_s25, 4  ;;  %p862_p0 = scmp.ge.s32.totalorder %s1111_s24, 1  ;;  %s221_s26 = int_to_ptr.vmem [resolvable:$true] %s220_s26 }
   0x4   : > { %p202_p1 = scmp.lt.s32.totalorder %s1111_s24, 3  ;;  %p1178_p3 = scmp.eq.s32.totalorder %s860_s27, 0 }
   0x5   : > { %s1114_s30 = smov [#allocation4]   ;;  %s1041_s12 = scalar_lea.hbm %s1285_s3, 2048 }
   0x6   : > { %p1172_p2 = pnand %p862_p0, %p202_p1  ;;  %s236_s8 = sshll.u32 %s1114_s30, 4  ;;  %s1190_s8 = int_to_ptr.vmem [resolvable:$true] %s236_s8 }
   0x7   : > { %s1294_s29 = scalar_select %p1178_p3, 1, 0 }
   0x8   : > { %s1293_s28 = scalar_select %p1172_p2, 1, 0 }
   0x9   : > { %p953_p4 = pneg %p1172_p2  ;;  %p1042_p6 = scmp.ne.s32.totalorder %s1285_s3, %s1041_s12 }
   0xa   : > { %p1048_p10 = scmp.lt.u32.totalorder %s1041_s12, %s1285_s3 }
   0xb   : > { %p1186_p5 = pnand %p1178_p3, %p953_p4 }
   0xd   : > { %p1043_p7 = pneg %p1186_p5 }
   0xf   : > { %p1044_p8 = pnand %p1043_p7, %p1042_p6 }
  0x11   : > { %p1045_p9 = pneg %p1044_p8 }
  0x13   : > { %p1050_p11 = pnand %p1048_p10, %p1045_p9 }
  0x15   : > { %1053 = shalt.err (!%p1050_p11)
}
  0x16   : > { %s1054_s17 = scalar_lea.vmem %s221_s26, 2048  ;;  %p1062_p1 = scmp.lt.s32.totalorder %s221_s26, %s221_s26 }
  0x17   : > { %p1055_p12 = scmp.ne.s32.totalorder %s221_s26, %s1054_s17  ;;  %p1063_p4 = scmp.lt.s32.totalorder %s1054_s17, %s1054_s17 }
  0x19   : > { %p1057_p13 = pnand %p1055_p12, %p1043_p7  ;;  %p1064_p3 = por %p1063_p4, %p1062_p1 }
  0x1b   : > { %p1058_p0 = pneg %p1057_p13 }
  0x1d   : > { %p1065_p2 = pnand %p1064_p3, %p1058_p0 }
  0x1f   : > { %1068 = shalt.err (!%p1065_p2)
}
  0x20   : > { %s1115_s18 = smov 128   ;;  %s1116_s19 = smov 8  }
  0x21   : > { %956 = dma.hbm_to_vmem [thread:$0]  (!%p1186_p5), %s1285_s3, 2048, %s221_s26, [#allocation3], %s1115_s18, %s1115_s18, %s1116_s19  }
  0x22   : > { %s1069_s25 = scalar_lea.hbm %s1287_s5, 2048 }
  0x23   : > { %p1070_p6 = scmp.ne.s32.totalorder %s1287_s5, %s1069_s25  ;;  %p1076_p8 = scmp.lt.u32.totalorder %s1069_s25, %s1287_s5 }
  0x25   : > { %p1072_p2 = pnand %p1070_p6, %p1043_p7 }
  0x27   : > { %p1073_p3 = pneg %p1072_p2 }
  0x29   : > { %p1078_p9 = pnand %p1076_p8, %p1073_p3 }
  0x2b   : > { %1081 = shalt.err (!%p1078_p9)
}
  0x2c   : > { %s1082_s26 = scalar_lea.vmem %s1190_s8, 2048  ;;  %p1090_p13 = scmp.lt.s32.totalorder %s1190_s8, %s1190_s8 }
  0x2d   : > { %p1083_p10 = scmp.ne.s32.totalorder %s1190_s8, %s1082_s26  ;;  %p1091_p0 = scmp.lt.s32.totalorder %s1082_s26, %s1082_s26 }
  0x2f   : > { %p1085_p11 = pnand %p1083_p10, %p1043_p7  ;;  %p1092_p1 = por %p1091_p0, %p1090_p13 }
  0x31   : > { %p1086_p12 = pneg %p1085_p11 }
  0x33   : > { %p1093_p4 = pnand %p1092_p1, %p1086_p12 }
  0x35   : > { %1096 = shalt.err (!%p1093_p4)
}
  0x36   : > { %s1117_s13 = smov 64   ;;  %s1118_s14 = smov 4  }
  0x37   : > { %959 = dma.hbm_to_vmem [thread:$0]  (!%p1186_p5), %s1287_s5, 2048, %s1190_s8, [#allocation5], %s1117_s13, %s1117_s13, %s1118_s14  }
  0x38   : > { %p1296_p6 = scmp.ne.s32.totalorder %s1293_s28, 0 }
  0x39   : > { %p1297_p7 = scmp.ne.s32.totalorder (!%p1296_p6), %s1294_s29, 0 }
  0x3a   : > { %264 = sbr.rel (%p1296_p6) target bundleno = 895 (0x37f), region = 48 }
  0x41   : > { %1102 = dma.done.wait (%p1297_p7), [#allocation3], 2048  }
  0x42   : > { %1104 = vsyncadd (%p1297_p7), [#allocation3], 4294965248 }
  0x43   : > { %1106 = dma.done.wait (%p1297_p7), [#allocation5], 2048  }
  0x44   : > { %1108 = vsyncadd (%p1297_p7), [#allocation5], 4294965248  ;;  %v1119_v0 = vmov 0.0   ;;  %vm342_vm0 = vcmask 1045504   ;;  %s869_s8 = sshll.u32 %s860_s27, 1  ;;  %vm1120_vm1 = vmmov 0   ;;  %v411_v53 = vlaneseq }
  0x45   : > { %937 = vmatprep.subr.bf16.mxu0 %v1119_v0  ;;  %941 = vmatprep.mubr.msk.bf16.mxu0 %vm1120_vm1, %v1119_v0  ;;  %p301_p5 = scmp.lt.s32.totalorder %s869_s8, 3  ;;  %vm343_vm2 = vcmask 1046528   ;;  %v1121_v1 = vmov 65535   ;;  %v983_v3 = vld [vmem:[%s1283_s1] sm:$0xff]   ;;  %v984_v5 = vld [vmem:[%s1283_s1 + $0x8] sm:$0x7f]  }
  0x46   : > { %v344_v2 = vsel %vm342_vm0, 4294967295, %v1121_v1  ;;  %938 = vmatpush3.bf16.msra.mxu0 %v983_v3  ;;  %v985_v9 = vld [vmem:[#allocation2 + $0x4] ss:$8 sps:$4 sm:$0xff]   ;;  %v987_v10 = vld [vmem:[#allocation2] ss:$8 sps:$4 sm:$0xff]   ;;  %vm338_vm3 = vcmask 236544  }
  0x47   : > { %s1299_s8 = smov (!%p301_p5, %s869_s8), 3  ;;  %v345_v4 = vsel %vm343_vm2, %v344_v2, 0  ;;  %939 = vmatprep.subr.bf16.mxu0 %v1119_v0  ;;  %v988_v11 = vld [vmem:[#allocation2 + $0x14] ss:$8 sps:$4 sm:$0xff]   ;;  %501 = vmatprep.subr.bf16.mxu1 %v985_v9  ;;  %v990_v13 = vld [vmem:[#allocation2 + $0x10] ss:$8 sps:$4 sm:$0xff]  }
  0x48   : > { %s870_s28 = sshll.u32 %s1299_s8, 3  ;;  %v347_v8 = vand.u32 %v984_v5, %v345_v4  ;;  %502 = vmatpush1.bf16.msra.mxu1 %v987_v10  ;;  %v991_v14 = vld [vmem:[#allocation2 + $0x24] ss:$8 sps:$4 sm:$0xff]   ;;  %v993_v15 = vld [vmem:[#allocation2 + $0x20] ss:$8 sps:$4 sm:$0xff]   ;;  %v1122_v26 = vmov 0  }
  0x49   : > { %s304_s27 = scalar_lea.vmem %s1282_s0, %s870_s28  ;;  %503 = vmatprep.subr.bf16.mxu1 %v988_v11  ;;  %v994_v16 = vld [vmem:[#allocation2 + $0x34] ss:$8 sps:$4 sm:$0xff]   ;;  %v996_v17 = vld [vmem:[#allocation2 + $0x30] ss:$8 sps:$4 sm:$0xff]   ;;  %v997_v18 = vld [vmem:[#allocation2 + $0x44] ss:$8 sps:$4 sm:$0xff]   ;;  %533 = vmatprep.mubr.bf16.mxu1 %v1122_v26  ;;  %s310_s13 = scalar_lea.vmem %s1289_s7, %s870_s28 }
  0x4a   : > { %v313_v6 = vld [vmem:[%s304_s27] sm:$0xff]  ;;  %v314_v7 = vld [vmem:[%s304_s27 + $0x8] sm:$0xff]  ;;  %940 = vmatpush3.bf16.msra.mxu0 %v347_v8  ;;  %v1000_v20 = vld [vmem:[#allocation2 + $0x54] ss:$8 sps:$4 sm:$0xff]   ;;  %v412_v54 = vshrl.u32 %v411_v53, 7  ;;  %s1123_s11 = smov 1  }
  0x4b   : > { %v315_v12 = vpack.c.bf16 %v314_v7, %v313_v6  ;;  %v999_v19 = vld [vmem:[#allocation2 + $0x40] ss:$8 sps:$4 sm:$0xff]   ;;  %v1002_v21 = vld [vmem:[#allocation2 + $0x50] ss:$8 sps:$4 sm:$0xff]   ;;  %v1003_v22 = vld [vmem:[#allocation2 + $0x64] ss:$8 sps:$4 sm:$0xff]  }
  0x4c   : > { %504 = vmatpush1.bf16.msra.mxu1 %v990_v13  ;;  %v1005_v23 = vld [vmem:[#allocation2 + $0x60] ss:$8 sps:$4 sm:$0xff]   ;;  %v1006_v24 = vld [vmem:[#allocation2 + $0x74] ss:$8 sps:$4 sm:$0xff]   ;;  %v1008_v25 = vld [vmem:[#allocation2 + $0x70] ss:$8 sps:$4 sm:$0xff]  }
  0x4d   : > { %942 = vmatmul.mubr.msk.bf16.vlgmr.msra.gmra.mrb[0].mxu0 %vm338_vm3, %v315_v12  ;;  %505 = vmatprep.subr.bf16.mxu1 %v991_v14  ;;  %v1009_v27 = vld [vmem:[#allocation4 + $0x40] sm:$0xff]   ;;  %v1011_v29 = vld [vmem:[#allocation4 + $0x48] sm:$0xff]   ;;  %v1013_v31 = vld [vmem:[#allocation4 + $0x50] sm:$0xff]   ;;  %v413_v55 = vsub.s32 0, %v412_v54  ;;  %v417_v57 = vsub.s32 1, %v412_v54  ;;  %vm776_vm4 = vcmask 7168  }
  0x4e   : > { %v1010_v28 = vld [vmem:[#allocation4] sm:$0xff]   ;;  %915 = vmatprep.subr.bf16.mxu0 %v1009_v27  ;;  %v1012_v30 = vld [vmem:[#allocation4 + $0x8] sm:$0xff]   ;;  %v1014_v32 = vld [vmem:[#allocation4 + $0x10] sm:$0xff]   ;;  %vm779_vm5 = vcmask 15360  }
  0x4f   : > { %916 = vmatpush3.bf16.msra.mxu0 %v1010_v28  ;;  %v1015_v33 = vld [vmem:[#allocation4 + $0x58] sm:$0xff]   ;;  %v1017_v35 = vld [vmem:[#allocation4 + $0x60] sm:$0xff]   ;;  %v1019_v37 = vld [vmem:[#allocation4 + $0x68] sm:$0xff]  }
  0x50   : > { %506 = vmatpush1.bf16.msra.mxu1 %v993_v15  ;;  %917 = vmatprep.subr.bf16.mxu0 %v1011_v29  ;;  %v1016_v34 = vld [vmem:[#allocation4 + $0x18] sm:$0xff]   ;;  %v1018_v36 = vld [vmem:[#allocation4 + $0x20] sm:$0xff]   ;;  %v1020_v48 = vld [vmem:[#allocation4 + $0x28] sm:$0xff]  }
  0x51   : > { %507 = vmatprep.subr.bf16.mxu1 %v994_v16  ;;  %v873_v38 = vld [vmem:[%s1284_s2] ss:$0 sm:$0xff]  ;;  %v1021_v49 = vld [vmem:[#allocation4 + $0x70] sm:$0xff]   ;;  %v1023_v51 = vld [vmem:[#allocation4 + $0x78] sm:$0xff]  }
  0x52   : > { %v1022_v50 = vld [vmem:[#allocation4 + $0x30] sm:$0xff]   ;;  %v1024_v52 = vld [vmem:[#allocation4 + $0x38] sm:$0xff]   ;;  %v409_v56 = vld [vmem:[%s1286_s4] sm:$0x3] }
  0x53   : > { %918 = vmatpush3.bf16.msra.mxu0 %v1012_v30  ;;  %v414_v58 = vrot.slane %v409_v56, %v413_v55  ;;  %v418_v59 = vrot.slane %v409_v56, %v417_v57  ;;  %v893_v11 = vld [vmem:[%s1288_s6] ss:$0 sm:$0xff] }
  0x54   : > { %508 = vmatpush1.bf16.msra.mxu1 %v996_v17  ;;  %919 = vmatprep.subr.bf16.mxu0 %v1013_v31 }
  0x55   : > { %509 = vmatprep.subr.bf16.mxu1 %v997_v18 }
  0x57   : > { %920 = vmatpush3.bf16.msra.mxu0 %v1014_v32 }
  0x58   : > { %510 = vmatpush1.bf16.msra.mxu1 %v999_v19  ;;  %921 = vmatprep.subr.bf16.mxu0 %v1015_v33 }
  0x59   : > { %511 = vmatprep.subr.bf16.mxu1 %v1000_v20 }
  0x5b   : > { %922 = vmatpush3.bf16.msra.mxu0 %v1016_v34 }
  0x5c   : > { %512 = vmatpush1.bf16.msra.mxu1 %v1002_v21  ;;  %923 = vmatprep.subr.bf16.mxu0 %v1017_v35 }
  0x5d   : > { %513 = vmatprep.subr.bf16.mxu1 %v1003_v22 }
  0x5f   : > { %924 = vmatpush3.bf16.msra.mxu0 %v1018_v36 }
  0x60   : > { %514 = vmatpush1.bf16.msra.mxu1 %v1005_v23  ;;  %925 = vmatprep.subr.bf16.mxu0 %v1019_v37 }
  0x61   : > { %515 = vmatprep.subr.bf16.mxu1 %v1006_v24 }
  0x63   : > { %926 = vmatpush3.bf16.msra.mxu0 %v1020_v48 }
  0x64   : > { %516 = vmatpush1.bf16.msra.mxu1 %v1008_v25  ;;  %927 = vmatprep.subr.bf16.mxu0 %v1021_v49 }
  0x67   : > { %928 = vmatpush3.bf16.msra.mxu0 %v1022_v50 }
  0x68   : > { %929 = vmatprep.subr.bf16.mxu0 %v1023_v51 }
  0x6b   : > { %930 = vmatpush3.bf16.msra.mxu0 %v1024_v52 }
 0x120   : > { %v383_v39 = vpop.f32.mrb[0].mxu0 }
 0x121   : > { %v384_v40 = vadd.f32 %v873_v38, %v383_v39  ;;  %v943_v41 = vpop.f32.mrb[1].mxu0 }
 0x122   : > { %v386_v42 = vpop.f32.mrb[2].mxu0 }
 0x123   : > { %v387_v43 = vadd.f32 %v873_v38, %v386_v42  ;;  %v944_v44 = vpop.f32.mrb[3].mxu0  ;;  %v390_v45 = vmax.f32 %v384_v40, 0.0 }
 0x125   : > { %v391_v46 = vmax.f32 %v387_v43, 0.0 }
 0x127   : > { %v392_v47 = vpack.c.bf16 %v391_v46, %v390_v45 }
 0x129   : > { %534 = vmatmul.mubr.bf16.vlgmr.msra.gmra.mrb[0].mxu1 %v392_v47 }
 0x1fc   : > { %v535_v60 = vpop.f32.mrb[0].mxu1 }
 0x1fd   : > { %v536_v61 = vadd.f32 %v535_v60, %v414_v58  ;;  %v537_v62 = vpop.f32.mrb[1].mxu1 }
 0x1fe   : > { %v538_v63 = vadd.f32 %v537_v62, %v418_v59  ;;  %v539_v0 = vpop.f32.mrb[2].mxu1 }
 0x1ff   : > { %v540_v1 = vadd.f32 %v539_v0, %v414_v58  ;;  %v541_v2 = vpop.f32.mrb[3].mxu1  ;;  %v544_v4 = vmax.f32 %v536_v61, 0.0 }
 0x200   : > { %v542_v3 = vadd.f32 %v541_v2, %v418_v59  ;;  %v545_v6 = vmax.f32 %v538_v63, 0.0 }
 0x201   : > { %v546_v5 = vmax.f32 %v540_v1, 0.0 }
 0x202   : > { %v547_v7 = vmax.f32 %v542_v3, 0.0 }
 0x203   : > { %v548_v8 = vpack.c.bf16 %v546_v5, %v544_v4 }
 0x204   : > { %v549_v9 = vpack.c.bf16 %v547_v7, %v545_v6 }
 0x206   : > { %717 = vmatprep.mubr.bf16.mxu0 %v549_v9 }
 0x207   : > { %718 = vmatmul.mubr.bf16.vlgmr.msra.gmra.mrb[4].mxu0 %v548_v8 }
 0x2da   : > { %v931_v10 = vpop.f32.mrb[4].mxu0 }
 0x2db   : > { %v932_v12 = vpop.f32.mrb[5].mxu0 }
 0x2dc   : > { %v933_v13 = vadd.f32 %v932_v12, %v931_v10  ;;  %v934_v14 = vpop.f32.mrb[6].mxu0 }
 0x2dd   : > { %v935_v15 = vpop.f32.mrb[7].mxu0 }
 0x2de   : > { %v720_v16 = vadd.f32 %v933_v13, %v893_v11  ;;  %v936_v17 = vadd.f32 %v935_v15, %v934_v14 }
 0x2e0   : > { %v723_v18 = vadd.f32 %v936_v17, %v893_v11  ;;  %v746_v19 = vsub.f32 0.0, %v720_v16  ;;  %v728_v41 = vand.u32 2147483647, %v720_v16  ;;  %v726_v54 = vmax.f32 %v720_v16, 0.0 }
 0x2e2   : > { %v747_v20 = vsub.f32 0.0, %v723_v18  ;;  %v750_v21 = vand.u32 2147483647, %v746_v19  ;;  %v748_v33 = vmax.f32 %v746_v19, 0.0  ;;  %v730_v42 = vsub.f32 0.0, %v728_v41 }
 0x2e3   : > { %v729_v43 = vand.u32 2147483647, %v723_v18  ;;  %v727_v57 = vmax.f32 %v723_v18, 0.0 }
 0x2e4   : > { %v751_v22 = vand.u32 2147483647, %v747_v20  ;;  %v752_v23 = vsub.f32 0.0, %v750_v21  ;;  %v749_v37 = vmax.f32 %v747_v20, 0.0  ;;  %v732_v44 = vmul.f32 1.442695, %v730_v42 }
 0x2e5   : > { %v731_v45 = vsub.f32 0.0, %v729_v43 }
 0x2e6   : > { %v753_v24 = vsub.f32 0.0, %v751_v22  ;;  %v754_v25 = vmul.f32 1.442695, %v752_v23 }
 0x2e7   : > { %v734_v46 = vmul.f32 1.442695, %v731_v45 }
 0x2e8   : > { %v756_v26 = vmul.f32 1.442695, %v753_v24  ;;  %1025 = vpow2.f32 %v754_v25 }
 0x2ea   : > { %1027 = vpow2.f32 %v756_v26 }
 0x2f2   : > { %v1026_v27 = vpop.eup %1025 }
 0x2f3   : > { %v758_v29 = vadd.f32 1.0, %v1026_v27 }
 0x2f4   : > { %v1028_v28 = vpop.eup %1027 }
 0x2f5   : > { %v759_v30 = vadd.f32 1.0, %v1028_v28  ;;  %1029 = vlog2.f32 %v758_v29 }
 0x2f7   : > { %1031 = vlog2.f32 %v759_v30 }
 0x2f8   : > { %1033 = vpow2.f32 %v732_v44 }
 0x2f9   : > { %1035 = vpow2.f32 %v734_v46 }
 0x2ff   : > { %v1030_v31 = vpop.eup %1029 }
 0x300   : > { %v761_v34 = vmul.f32 0.6931472, %v1030_v31 }
 0x301   : > { %v1032_v32 = vpop.eup %1031 }
 0x302   : > { %v763_v35 = vmul.f32 0.6931472, %v1032_v32  ;;  %v764_v36 = vadd.f32 %v761_v34, %v748_v33  ;;  %v1034_v47 = vpop.eup %1033 }
 0x303   : > { %v736_v48 = vadd.f32 1.0, %v1034_v47  ;;  %v1036_v49 = vpop.eup %1035 }
 0x304   : > { %v766_v38 = vsub.f32 0.0, %v764_v36  ;;  %v765_v39 = vadd.f32 %v763_v35, %v749_v37  ;;  %v737_v50 = vadd.f32 1.0, %v1036_v49 }
 0x305   : > { %1037 = vlog2.f32 %v736_v48 }
 0x306   : > { %770 = vrot.lane.b32.xlu0 %v766_v38, %s1123_s11  ;;  %v767_v40 = vsub.f32 0.0, %v765_v39  ;;  %1039 = vlog2.f32 %v737_v50 }
 0x30a   : > { %772 = vrot.lane.b32.xlu0 %v767_v40, %s1123_s11 }
 0x30f   : > { %v1038_v51 = vpop.eup %1037 }
 0x310   : > { %v739_v52 = vmul.f32 0.6931472, %v1038_v51  ;;  %v1040_v53 = vpop.eup %1039 }
 0x311   : > { %v741_v56 = vmul.f32 0.6931472, %v1040_v53 }
 0x312   : > { %v742_v55 = vadd.f32 %v739_v52, %v726_v54 }
 0x313   : > { %v743_v59 = vadd.f32 %v741_v56, %v727_v57 }
 0x314   : > { %v744_v58 = vsub.f32 0.0, %v742_v55 }
 0x315   : > { %v745_v62 = vsub.f32 0.0, %v743_v59 }
 0x378   : > { %v771_v60 = vpop.permute.xlu0 %770 }
 0x379   : > { %v777_v61 = vsel %vm776_vm4, %v744_v58, %v771_v60 }
 0x37a   : > { %780 = vst.msk [vmem:[%s310_s13] sm:$0xff] %vm779_vm5, %v777_v61 }
 0x37c   : > { %v773_v63 = vpop.permute.xlu0 %772 }
 0x37d   : > { %v778_v0 = vsel %vm776_vm4, %v745_v62, %v773_v63 }
 0x37e   : > { %781 = vst.msk [vmem:[%s310_s13 + $0x8] sm:$0xff] %vm779_vm5, %v778_v0 }
 0x37f PF: > { %s19_s24 = sadd.s32 1, %s1111_s24  }
 0x380   : > { %p16_p2 = scmp.ge.s32.totalorder %s19_s24, 4  }
 0x382   :  { %18 = sbr.rel (!%p16_p2) target bundleno = 2 (0x2), region = 87 }
 0x389   :  { %804 = vsyncpa [#allocation3], 1 }
 0x38a   :  { %806 = vsyncpa [#allocation3 + $0x1], 1 }
 0x38b   :  { %807 = vsyncpa [#allocation5], 1 }

</bundles_post_ra>
